<compile_context>
chip_gen: v7x
topology: tpu7x:2x2x1
jax: 0.10.0
libtpu: 0.0.40
codegen_flags: <defaults>
</compile_context>

<pallas_src>
import jax
import jax.numpy as jnp
from jax.experimental import pallas as pl
from jax.experimental.pallas import tpu as pltpu

_LANES = 128
# ~4 MiB per tile buffer; with input+output double-buffered -> ~16 MiB live.
_TARGET_TILE_BYTES = 4 * 1024 * 1024
_VMEM_LIMIT_BYTES = 32 * 1024 * 1024


def _swish_kernel(beta_ref, x_ref, o_ref):
    # beta_ref: (1, 1) f32 scalar in SMEM; x_ref / o_ref: (tile_rows, 128) VMEM tiles.
    beta = beta_ref[0, 0]                 # read once; broadcast handled by the VPU
    xf = x_ref[...].astype(jnp.float32)   # f32 math (beta is f32, matches PyTorch)
    # sigmoid(z) = 0.5 * tanh(0.5 * z) + 0.5  -> one EUP op instead of exp + divide.
    sig = 0.5 * jnp.tanh(0.5 * (beta * xf)) + 0.5
    o_ref[...] = (xf * sig).astype(o_ref.dtype)


def _round_up(a: int, b: int) -> int:
    return ((a + b - 1) // b) * b


def swish(x: jax.Array, beta: jax.Array) -> jax.Array:
    """Elementwise x * sigmoid(beta * x); x: any float shape, beta: scalar."""
    orig_shape = x.shape
    orig_dtype = x.dtype
    assert jnp.issubdtype(orig_dtype, jnp.floating), "swish expects a float dtype"

    n = x.size
    if n == 0:  # zero-sized input: nothing to do
        return x

    itemsize = jnp.dtype(orig_dtype).itemsize
    rows = pl.cdiv(n, _LANES)
    n_lanes = rows * _LANES

    # Row count per tile targeting ~4 MiB; multiple of 32 for clean sublane
    # packing across dtypes. Cap at ~half the rows (rounded up to 32) so any
    # tensor larger than one tile gets at least 2 grid steps (megacore on v7x).
    target_rows = max(32, (_TARGET_TILE_BYTES // (_LANES * itemsize)) // 32 * 32)
    tile_rows = min(target_rows, _round_up(pl.cdiv(rows, 2), 32))
    if tile_rows >= rows:
        tile_rows = rows  # single block spanning the full row extent (always legal)

    flat = x.reshape(-1)
    needs_pad = n_lanes != n
    if needs_pad:  # pad only to the next lane multiple (< 128 extra elements)
        flat = jnp.pad(flat, (0, n_lanes - n))
    x2d = flat.reshape(rows, _LANES)

    beta2d = jnp.asarray(beta, jnp.float32).reshape(1, 1)

    out2d = pl.pallas_call(
        _swish_kernel,
        out_shape=jax.ShapeDtypeStruct((rows, _LANES), orig_dtype),
        grid=(pl.cdiv(rows, tile_rows),),   # partial final block handled by Pallas
        in_specs=[
            pl.BlockSpec(memory_space=pltpu.SMEM),                 # beta scalar
            pl.BlockSpec((tile_rows, _LANES), lambda i: (i, 0)),   # x tile
        ],
        out_specs=pl.BlockSpec((tile_rows, _LANES), lambda i: (i, 0)),
        compiler_params=pltpu.CompilerParams(
            dimension_semantics=("parallel",),      # megacore sharding on v7x
            vmem_limit_bytes=_VMEM_LIMIT_BYTES,     # 16 MiB live fits under 32 MiB
        ),
    )(beta2d, x2d)

    out_flat = out2d.reshape(-1)
    if needs_pad:  # slice only when we actually padded
        out_flat = out_flat[:n]
    return out_flat.reshape(orig_shape)


if __name__ == "__main__":
    key = jax.random.PRNGKey(0)

    # Deterministic parameter init, same as nn.Parameter(torch.tensor(1.0)).
    beta = jnp.float32(1.0)

    # Small NCHW activation matching the module's typical usage (lane-aligned).
    x = jax.random.normal(key, (2, 4, 16, 16), dtype=jnp.float32)
    out = jax.block_until_ready(swish(x, beta))
    ref = x * jax.nn.sigmoid(beta * x)
    assert out.shape == x.shape and out.dtype == x.dtype
    assert jnp.allclose(out, ref, atol=1e-5, rtol=1e-5)

    # Non-lane-aligned shape: exercises the 128-lane pad + partial-block path.
    x2 = jax.random.normal(jax.random.PRNGKey(1), (3, 5, 7), dtype=jnp.float32)
    out2 = jax.block_until_ready(swish(x2, beta))
    ref2 = x2 * jax.nn.sigmoid(beta * x2)
    assert jnp.allclose(out2, ref2, atol=1e-5, rtol=1e-5)

    # Larger lane-aligned shape: >1 tile row block, exercises the cdiv grid.
    x3 = jax.random.normal(jax.random.PRNGKey(2), (2, 4, 16, 128), dtype=jnp.float32)
    out3 = jax.block_until_ready(swish(x3, beta))
    ref3 = x3 * jax.nn.sigmoid(beta * x3)
    assert jnp.allclose(out3, ref3, atol=1e-5, rtol=1e-5)

    print("KERNEL_OK")
</pallas_src>

<mosaic_0001>
module attributes {stable_mosaic.version = 11 : i64} {
  func.func @_swish_kernel(%arg0: i32, %arg1: memref<1x1xf32, #tpu.memory_space<smem>>, %arg2: memref<16x128xf32, #tpu.memory_space<vmem>>, %arg3: memref<16x128xf32, #tpu.memory_space<vmem>>) attributes {dimension_semantics = [#tpu.dimension_semantics<parallel>], iteration_bounds = array<i64: 1>, scalar_prefetch = 0 : i64, scratch_operands = 0 : i64, tpu.core_type = #tpu.core_type<tc>, window_params = [{transform_indices = @transform_0, window_bounds = array<i64: 1, 1>}, {transform_indices = @transform_1, window_bounds = array<i64: 16, 128>}, {transform_indices = @transform_2, window_bounds = array<i64: 16, 128>}]} {
    %c0 = arith.constant 0 : index
    %c0_0 = arith.constant 0 : index
    %0 = memref.load %arg1[%c0, %c0_0] : memref<1x1xf32, #tpu.memory_space<smem>>
    %c0_1 = arith.constant 0 : index
    %c0_2 = arith.constant 0 : index
    %1 = vector.load %arg2[%c0_1, %c0_2] : memref<16x128xf32, #tpu.memory_space<vmem>>, vector<16x128xf32>
    %2 = vector.broadcast %0 : f32 to vector<16x128xf32>
    %3 = arith.mulf %2, %1 : vector<16x128xf32>
    %cst = arith.constant 5.000000e-01 : f32
    %4 = vector.broadcast %cst : f32 to vector<16x128xf32>
    %5 = arith.mulf %4, %3 : vector<16x128xf32>
    %6 = math.tanh %5 : vector<16x128xf32>
    %cst_3 = arith.constant 5.000000e-01 : f32
    %7 = vector.broadcast %cst_3 : f32 to vector<16x128xf32>
    %8 = arith.mulf %7, %6 : vector<16x128xf32>
    %cst_4 = arith.constant 5.000000e-01 : f32
    %9 = vector.broadcast %cst_4 : f32 to vector<16x128xf32>
    %10 = arith.addf %8, %9 : vector<16x128xf32>
    %11 = arith.mulf %1, %10 : vector<16x128xf32>
    %c0_5 = arith.constant 0 : index
    %c0_6 = arith.constant 0 : index
    %12 = vector.load %arg3[%c0_5, %c0_6] : memref<16x128xf32, #tpu.memory_space<vmem>>, vector<16x128xf32>
    tpu.vector_store %arg3[%c0_5, %c0_6], %11 {strides = array<i32>} : memref<16x128xf32, #tpu.memory_space<vmem>>, vector<16x128xf32>,
    return
  }
  func.func @transform_0(%arg0: i32) -> (i32, i32) {
    %c0_i32 = arith.constant 0 : i32
    %c0_i32_0 = arith.constant 0 : i32
    %c0_i32_1 = arith.constant 0 : i32
    return %c0_i32, %c0_i32_0 : i32, i32
  }
  func.func @transform_1(%arg0: i32) -> (i32, i32) {
    %c0_i32 = arith.constant 0 : i32
    %c0_i32_0 = arith.constant 0 : i32
    return %arg0, %c0_i32 : i32, i32
  }
  func.func @transform_2(%arg0: i32) -> (i32, i32) {
    %c0_i32 = arith.constant 0 : i32
    %c0_i32_0 = arith.constant 0 : i32
    return %arg0, %c0_i32 : i32, i32
  }
}

</mosaic_0001>

<bundles_post_ra>
// kernel: tpu_custom_call.1
= control target key start
LH: loop header
LB: loop body
LE: loop exit
PB: predicated region body
PF: predicated region fallthrough
CT: control target
= control target key end

     0   :  { %8 = vsyncpa [#allocation4], 0  ;;  %s170_s0 = inlined_call_operand.<no memory space> [shape: f32[1,1], index: 0, kind: input, shape index: {}]   ;;  %s171_s1 = inlined_call_operand.hbm [shape: f32[16,128], index: 1, kind: input, shape index: {}]   ;;  %s172_s2 = inlined_call_operand.hbm [shape: f32[16,128], index: 2, kind: output, shape index: {}]  }
   0x1   :  { %9 = vsyncpa [#allocation5], 0  ;;  %s118_s9 = smov [#allocation3]   ;;  %s70_s13 = scalar_lea.hbm %s171_s1, 256 }
   0x2   :  { %s17_s10 = sshll.u32 %s118_s9, 4  ;;  %p71_p0 = scmp.ne.s32.totalorder %s171_s1, %s70_s13  ;;  %s18_s10 = int_to_ptr.vmem [resolvable:$true] %s17_s10 }
   0x3   :  { %p74_p1 = scmp.lt.u32.totalorder %s70_s13, %s171_s1 }
   0x5   :  { %p76_p2 = pnand %p74_p1, %p71_p0 }
   0x7   :  { %79 = shalt.err (!%p76_p2)
}
   0x8   :  { %s80_s18 = scalar_lea.vmem %s18_s10, 256  ;;  %p85_p4 = scmp.lt.s32.totalorder %s18_s10, %s18_s10 }
   0x9   :  { %p81_p3 = scmp.ne.s32.totalorder %s18_s10, %s80_s18  ;;  %p86_p5 = scmp.lt.s32.totalorder %s80_s18, %s80_s18 }
   0xb   :  { %p87_p6 = por %p86_p5, %p85_p4 }
   0xd   :  { %p88_p7 = pnand %p87_p6, %p81_p3 }
   0xf   :  { %91 = shalt.err (!%p88_p7)
}
  0x10   :  { %s119_s19 = smov 128   ;;  %s120_s20 = smov 8  }
  0x11   :  { %23 = dma.hbm_to_vmem [thread:$0]  %s171_s1, 256, %s18_s10, [#allocation4], %s119_s19, %s119_s19, %s120_s20  }
  0x12   :  { %114 = dma.done.wait [#allocation4], 256  }
  0x13   :  { %115 = vsyncadd [#allocation4], 4294967040  ;;  %v30_v0 = vstv %s170_s0  ;;  %v28_v1 = vld [vmem:[#allocation3] sm:$0xff]  ;;  %v29_v2 = vld [vmem:[#allocation3 + $0x8] sm:$0xff]  ;;  %s121_s1 = smov [#allocation6]  }
  0x14   :  { %v31_v3 = vmul.f32 %v30_v0, %v28_v1  ;;  %v32_v4 = vmul.f32 %v30_v0, %v29_v2  ;;  %s50_s25 = sshll.u32 %s121_s1, 4  ;;  %s51_s25 = int_to_ptr.vmem [resolvable:$true] %s50_s25 }
  0x15   :  { %s92_s0 = scalar_lea.vmem %s51_s25, 256  ;;  %p97_p9 = scmp.lt.s32.totalorder %s51_s25, %s51_s25 }
  0x16   :  { %v33_v5 = vmul.f32 0.5, %v31_v3  ;;  %v34_v6 = vmul.f32 0.5, %v32_v4  ;;  %p93_p8 = scmp.ne.s32.totalorder %s51_s25, %s92_s0  ;;  %p98_p10 = scmp.lt.s32.totalorder %s92_s0, %s92_s0 }
  0x18   :  { %66 = vtanh.f32 %v33_v5  ;;  %p99_p11 = por %p98_p10, %p97_p9 }
  0x19   :  { %68 = vtanh.f32 %v34_v6 }
  0x1a   :  { %p100_p12 = pnand %p99_p11, %p93_p8 }
  0x22   :  { %v67_v7 = vpop.eup %66 }
  0x23   :  { %v69_v8 = vpop.eup %68  ;;  %v37_v9 = vmul.f32 0.5, %v67_v7 }
  0x24   :  { %v38_v10 = vmul.f32 0.5, %v69_v8 }
  0x25   :  { %v39_v11 = vadd.f32 0.5, %v37_v9 }
  0x26   :  { %v40_v12 = vadd.f32 0.5, %v38_v10 }
  0x27   :  { %v41_v13 = vmul.f32 %v39_v11, %v28_v1 }
  0x28   :  { %v42_v14 = vmul.f32 %v40_v12, %v29_v2 }
  0x29   :  { %43 = vst [vmem:[#allocation6] sm:$0xff] %v41_v13 }
  0x2a   :  { %44 = vst [vmem:[#allocation6 + $0x8] sm:$0xff] %v42_v14 }
  0x2b   :  { %103 = shalt.err (!%p100_p12)
}
  0x2c   :  { %s104_s28 = scalar_lea.hbm %s172_s2, 256 }
  0x2d   :  { %p105_p13 = scmp.ne.s32.totalorder %s172_s2, %s104_s28  ;;  %p108_p0 = scmp.lt.u32.totalorder %s104_s28, %s172_s2 }
  0x2f   :  { %p110_p1 = pnand %p108_p0, %p105_p13 }
  0x31   :  { %113 = shalt.err (!%p110_p1)
}
  0x32   :  { %56 = dma.vmem_to_hbm [thread:$0]  %s51_s25, 256, %s172_s2, [#allocation5], %s119_s19, %s119_s19, %s120_s20  }
  0x33   :  { %116 = dma.done.wait [#allocation5], 256  }
  0x34   :  { %117 = vsyncadd [#allocation5], 4294967040 }
  0x35   :  { %60 = vsyncpa [#allocation4], 1 }
  0x36   :  { %61 = vsyncpa [#allocation5], 1 }

</bundles_post_ra>
